<compile_context>
chip_gen: v7x
topology: tpu7x:2x2x1
jax: 0.10.0
libtpu: 0.0.40
codegen_flags: <defaults>
</compile_context>

<pallas_src>
import math

import jax
import jax.numpy as jnp
from jax.experimental import pallas as pl
from jax.experimental.pallas import tpu as pltpu


def _pe_flat_kernel(tp_ref, freq_ref, phase_ref, out_ref, y_ref):
    """Sinusoidal time embedding in a lane-dense flat layout.

    tp_ref   : (TB, L)    f32  observed timepoints for TB batch rows
    freq_ref : (1, D*L)   f32  freq_flat[d*L + l]  = 1 / 10000^((d - d%2)/D)
    phase_ref: (1, D*L)   f32  phase_flat[d*L + l] = (d % 2) * pi/2
    out_ref  : (TB, D*L)  f32  out[b, d*L + l] = sin(tp[b, l]*freq[d] + phase[d])
    y_ref    : (TB, D*L)  f32  VMEM scratch
    """
    TB, L = tp_ref.shape
    C = out_ref.shape[1]
    D = C // L

    # Place tp in the first L lanes of the flat scratch, zeros elsewhere.
    y_ref[...] = jnp.zeros_like(y_ref)
    y_ref[:, 0:L] = tp_ref[...]
    y = y_ref[...]

    # Replicate the length-L pattern across all D periods of the lane axis
    # with ceil(log2(D)) XLU rotations (cheap: XLU slot, no gather/reshape).
    # Rolls are multiples of L, so every covered lane j holds tp[b, j mod L];
    # the coverage mask makes this correct for any roll direction and any D.
    lane = jax.lax.broadcasted_iota(jnp.int32, (TB, C), 1)
    cov = (lane < L).astype(jnp.float32)
    copies, shift = 1, L
    while copies < D:
        rolled_y = pltpu.roll(y, shift=shift, axis=1)
        rolled_c = pltpu.roll(cov, shift=shift, axis=1)
        keep = cov > 0.5
        y = jnp.where(keep, y, rolled_y)
        cov = jnp.maximum(cov, rolled_c)
        copies *= 2
        shift *= 2

    # Single sin (phase trick replaces sin + cos + select); freq/phase tables
    # are precomputed in the wrapper, so no transcendental rebuild per step.
    out_ref[...] = jnp.sin(y * freq_ref[...] + phase_ref[...])


def get_side_info(observed_tp, K, d_model):
    """observed_tp: (B, L) float32 -> side_info (B, d_model, K, L) float32.

    The Pallas kernel writes only the non-redundant (B, d_model*L) slab with a
    lane-dense trailing axis; the K broadcast and the reshape to
    (B, d_model, K, L) are left to XLA (a fused consumer could elide them).
    """
    observed_tp = observed_tp.astype(jnp.float32)
    B, L = observed_tp.shape
    D = d_model
    C = D * L

    # Hoisted frequency / phase tables (match the reference's jnp.power form).
    d_idx = jnp.arange(D, dtype=jnp.int32)
    freq_per_d = 1.0 / jnp.power(
        jnp.float32(10000.0),
        (d_idx - d_idx % 2).astype(jnp.float32) / jnp.float32(D))
    phase_per_d = (d_idx % 2).astype(jnp.float32) * jnp.float32(math.pi / 2.0)
    freq_flat = jnp.repeat(freq_per_d, L).reshape(1, C)    # index c//L == d
    phase_flat = jnp.repeat(phase_per_d, L).reshape(1, C)

    # Row tiling: all of B in one grid step when small (per-step overhead
    # dominates otherwise); for large B use multiples of 8 rows bounded so the
    # double-buffered output block + scratch stay well under v7x's scoped VMEM.
    bytes_per_row = 4 * C
    budget = 4 << 20                         # ~4 MiB per output buffer
    if B * bytes_per_row <= budget:
        tb = B
    else:
        tb = max(8, min(B, (budget // bytes_per_row) // 8 * 8))
    grid = (pl.cdiv(B, tb),)

    pe_flat = pl.pallas_call(
        _pe_flat_kernel,
        out_shape=jax.ShapeDtypeStruct((B, C), jnp.float32),
        grid=grid,
        in_specs=[
            pl.BlockSpec((tb, L), lambda i: (i, 0)),
            pl.BlockSpec((1, C), lambda i: (0, 0)),
            pl.BlockSpec((1, C), lambda i: (0, 0)),
        ],
        out_specs=pl.BlockSpec((tb, C), lambda i: (i, 0)),
        scratch_shapes=[pltpu.VMEM((tb, C), jnp.float32)],
        compiler_params=pltpu.CompilerParams(
            dimension_semantics=("parallel",)),   # shards B-tiles across TCs on v7x
    )(observed_tp, freq_flat, phase_flat)

    # Thin layout plumbing in XLA: c = d*L + l  ->  (B, D, L), broadcast K.
    pe = pe_flat.reshape(B, D, L)
    side_info = jnp.broadcast_to(pe[:, :, None, :], (B, D, K, L))
    return side_info


def timeseries_encoder_forward(observed_data, observed_tp, d_model):
    """Mirrors TimeSeriesEncoder.forward up to the undefined diffmodel call.

    observed_data: (B, K, L)   -- plays the role of cond_mask in get_side_info
    observed_tp  : (B, L)
    Returns (side_info, total_input):
      side_info  : (B, d_model, K, L)
      total_input: (B, 1, K, L)      (== observed_data.unsqueeze(1))
    """
    observed_data = observed_data.astype(jnp.float32)
    observed_tp = observed_tp.astype(jnp.float32)
    B, K, L = observed_data.shape
    side_info = get_side_info(observed_tp, K, d_model)
    total_input = observed_data[:, None, :, :]   # unsqueeze(1): zero-copy in XLA
    # TODO(synk): encoded = self.diffmodel(total_input, side_info) has no
    #             definition in the provided module source.
    return side_info, total_input


def _reference_side_info(observed_tp, K, d_model):
    """Plain-JAX reference replicating the PyTorch time_embedding/get_side_info."""
    B, L = observed_tp.shape
    idx = jnp.arange(0, d_model, 2, dtype=jnp.float32)
    div_term = 1.0 / jnp.power(jnp.float32(10000.0), idx / d_model)
    position = observed_tp[:, :, None]                            # (B, L, 1)
    pe = jnp.zeros((B, L, d_model), jnp.float32)
    pe = pe.at[:, :, 0::2].set(jnp.sin(position * div_term))
    pe = pe.at[:, :, 1::2].set(jnp.cos(position * div_term))
    te = jnp.broadcast_to(pe[:, :, None, :], (B, L, K, d_model))  # unsqueeze+expand
    return jnp.transpose(te, (0, 3, 2, 1))                        # permute(0,3,2,1)


if __name__ == "__main__":
    # Small shapes consistent with the module: batch=2, K=4 features,
    # horizon L=16, emb_time_dim (dim_val) = 32.
    B, K, L, D = 2, 4, 16, 32
    key = jax.random.PRNGKey(0)
    k1, k2 = jax.random.split(key)
    observed_data = jax.random.normal(k1, (B, K, L), dtype=jnp.float32)
    observed_tp = (jnp.broadcast_to(jnp.arange(L, dtype=jnp.float32), (B, L))
                   + 0.05 * jax.random.normal(k2, (B, L), dtype=jnp.float32))

    side_info, total_input = timeseries_encoder_forward(observed_data,
                                                        observed_tp, D)
    side_info = jax.block_until_ready(side_info)
    total_input = jax.block_until_ready(total_input)

    assert side_info.shape == (B, D, K, L)
    assert total_input.shape == (B, 1, K, L)

    ref = _reference_side_info(observed_tp, K, D)
    assert jnp.allclose(side_info, ref, atol=1e-4, rtol=1e-4), "mismatch vs reference"
    assert jnp.array_equal(total_input[:, 0], observed_data)

    print("KERNEL_OK")
</pallas_src>

<mosaic_0001>
module attributes {stable_mosaic.version = 11 : i64} {
  func.func @_pe_flat_kernel(%arg0: i32, %arg1: memref<2x16xf32, #tpu.memory_space<vmem>>, %arg2: memref<1x512xf32, #tpu.memory_space<vmem>>, %arg3: memref<1x512xf32, #tpu.memory_space<vmem>>, %arg4: memref<2x512xf32, #tpu.memory_space<vmem>>, %arg5: memref<2x512xf32, #tpu.memory_space<vmem>>) attributes {dimension_semantics = [#tpu.dimension_semantics<parallel>], iteration_bounds = array<i64: 1>, scalar_prefetch = 0 : i64, scratch_operands = 1 : i64, tpu.core_type = #tpu.core_type<tc>, window_params = [{transform_indices = @transform_0, window_bounds = array<i64: 2, 16>}, {pipeline_mode = #tpu.pipeline_mode<synchronous>, transform_indices = @transform_1, window_bounds = array<i64: 1, 512>}, {pipeline_mode = #tpu.pipeline_mode<synchronous>, transform_indices = @transform_2, window_bounds = array<i64: 1, 512>}, {transform_indices = @transform_3, window_bounds = array<i64: 2, 512>}]} {
    %cst = arith.constant 0.000000e+00 : f32
    %0 = vector.broadcast %cst : f32 to vector<2x512xf32>
    %c0 = arith.constant 0 : index
    %c0_0 = arith.constant 0 : index
    %1 = vector.load %arg5[%c0, %c0_0] : memref<2x512xf32, #tpu.memory_space<vmem>>, vector<2x512xf32>
    tpu.vector_store %arg5[%c0, %c0_0], %0 {strides = array<i32>} : memref<2x512xf32, #tpu.memory_space<vmem>>, vector<2x512xf32>,
    %c0_1 = arith.constant 0 : index
    %c0_2 = arith.constant 0 : index
    %2 = vector.load %arg1[%c0_1, %c0_2] : memref<2x16xf32, #tpu.memory_space<vmem>>, vector<2x16xf32>
    %c0_3 = arith.constant 0 : index
    %c0_4 = arith.constant 0 : index
    %3 = vector.load %arg5[%c0_3, %c0_4] : memref<2x512xf32, #tpu.memory_space<vmem>>, vector<2x16xf32>
    tpu.vector_store %arg5[%c0_3, %c0_4], %2 {strides = array<i32>} : memref<2x512xf32, #tpu.memory_space<vmem>>, vector<2x16xf32>,
    %c0_5 = arith.constant 0 : index
    %c0_6 = arith.constant 0 : index
    %4 = vector.load %arg5[%c0_5, %c0_6] : memref<2x512xf32, #tpu.memory_space<vmem>>, vector<2x512xf32>
    %5 = tpu.iota {dimensions = array<i32: 1>} : vector<2x512xi32>
    %c16_i32 = arith.constant 16 : i32
    %6 = vector.broadcast %c16_i32 : i32 to vector<2x512xi32>
    %7 = arith.cmpi slt, %5, %6 : vector<2x512xi32>
    %8 = arith.extui %7 : vector<2x512xi1> to vector<2x512xi32>
    %9 = arith.sitofp %8 : vector<2x512xi32> to vector<2x512xf32>
    %c16_i32_7 = arith.constant 16 : i32
    %10 = tpu.dynamic_rotate %4 by %c16_i32_7 dim 1 : vector<2x512xf32>, i32 -> vector<2x512xf32>
    %c16_i32_8 = arith.constant 16 : i32
    %11 = tpu.dynamic_rotate %9 by %c16_i32_8 dim 1 : vector<2x512xf32>, i32 -> vector<2x512xf32>
    %cst_9 = arith.constant 5.000000e-01 : f32
    %12 = vector.broadcast %cst_9 : f32 to vector<2x512xf32>
    %13 = arith.cmpf ogt, %9, %12 : vector<2x512xf32>
    %14 = arith.select %13, %4, %10 : vector<2x512xi1>, vector<2x512xf32>
    %15 = arith.maximumf %9, %11 : vector<2x512xf32>
    %c32_i32 = arith.constant 32 : i32
    %16 = tpu.dynamic_rotate %14 by %c32_i32 dim 1 : vector<2x512xf32>, i32 -> vector<2x512xf32>
    %c32_i32_10 = arith.constant 32 : i32
    %17 = tpu.dynamic_rotate %15 by %c32_i32_10 dim 1 : vector<2x512xf32>, i32 -> vector<2x512xf32>
    %cst_11 = arith.constant 5.000000e-01 : f32
    %18 = vector.broadcast %cst_11 : f32 to vector<2x512xf32>
    %19 = arith.cmpf ogt, %15, %18 : vector<2x512xf32>
    %20 = arith.select %19, %14, %16 : vector<2x512xi1>, vector<2x512xf32>
    %21 = arith.maximumf %15, %17 : vector<2x512xf32>
    %c64_i32 = arith.constant 64 : i32
    %22 = tpu.dynamic_rotate %20 by %c64_i32 dim 1 : vector<2x512xf32>, i32 -> vector<2x512xf32>
    %c64_i32_12 = arith.constant 64 : i32
    %23 = tpu.dynamic_rotate %21 by %c64_i32_12 dim 1 : vector<2x512xf32>, i32 -> vector<2x512xf32>
    %cst_13 = arith.constant 5.000000e-01 : f32
    %24 = vector.broadcast %cst_13 : f32 to vector<2x512xf32>
    %25 = arith.cmpf ogt, %21, %24 : vector<2x512xf32>
    %26 = arith.select %25, %20, %22 : vector<2x512xi1>, vector<2x512xf32>
    %27 = arith.maximumf %21, %23 : vector<2x512xf32>
    %c128_i32 = arith.constant 128 : i32
    %28 = tpu.dynamic_rotate %26 by %c128_i32 dim 1 : vector<2x512xf32>, i32 -> vector<2x512xf32>
    %c128_i32_14 = arith.constant 128 : i32
    %29 = tpu.dynamic_rotate %27 by %c128_i32_14 dim 1 : vector<2x512xf32>, i32 -> vector<2x512xf32>
    %cst_15 = arith.constant 5.000000e-01 : f32
    %30 = vector.broadcast %cst_15 : f32 to vector<2x512xf32>
    %31 = arith.cmpf ogt, %27, %30 : vector<2x512xf32>
    %32 = arith.select %31, %26, %28 : vector<2x512xi1>, vector<2x512xf32>
    %33 = arith.maximumf %27, %29 : vector<2x512xf32>
    %c256_i32 = arith.constant 256 : i32
    %34 = tpu.dynamic_rotate %32 by %c256_i32 dim 1 : vector<2x512xf32>, i32 -> vector<2x512xf32>
    %cst_16 = arith.constant 5.000000e-01 : f32
    %35 = vector.broadcast %cst_16 : f32 to vector<2x512xf32>
    %36 = arith.cmpf ogt, %33, %35 : vector<2x512xf32>
    %37 = arith.select %36, %32, %34 : vector<2x512xi1>, vector<2x512xf32>
    %c0_17 = arith.constant 0 : index
    %c0_18 = arith.constant 0 : index
    %38 = vector.load %arg2[%c0_17, %c0_18] : memref<1x512xf32, #tpu.memory_space<vmem>>, vector<1x512xf32>
    %39 = vector.broadcast %38 : vector<1x512xf32> to vector<2x512xf32>
    %40 = arith.mulf %37, %39 : vector<2x512xf32>
    %c0_19 = arith.constant 0 : index
    %c0_20 = arith.constant 0 : index
    %41 = vector.load %arg3[%c0_19, %c0_20] : memref<1x512xf32, #tpu.memory_space<vmem>>, vector<1x512xf32>
    %42 = vector.broadcast %41 : vector<1x512xf32> to vector<2x512xf32>
    %43 = arith.addf %40, %42 : vector<2x512xf32>
    %44 = math.sin %43 : vector<2x512xf32>
    %c0_21 = arith.constant 0 : index
    %c0_22 = arith.constant 0 : index
    %45 = vector.load %arg4[%c0_21, %c0_22] : memref<2x512xf32, #tpu.memory_space<vmem>>, vector<2x512xf32>
    tpu.vector_store %arg4[%c0_21, %c0_22], %44 {strides = array<i32>} : memref<2x512xf32, #tpu.memory_space<vmem>>, vector<2x512xf32>,
    return
  }
  func.func @transform_0(%arg0: i32) -> (i32, i32) {
    %c0_i32 = arith.constant 0 : i32
    %c0_i32_0 = arith.constant 0 : i32
    return %arg0, %c0_i32 : i32, i32
  }
  func.func @transform_1(%arg0: i32) -> (i32, i32) {
    %c0_i32 = arith.constant 0 : i32
    %c0_i32_0 = arith.constant 0 : i32
    %c0_i32_1 = arith.constant 0 : i32
    return %c0_i32, %c0_i32_0 : i32, i32
  }
  func.func @transform_2(%arg0: i32) -> (i32, i32) {
    %c0_i32 = arith.constant 0 : i32
    %c0_i32_0 = arith.constant 0 : i32
    %c0_i32_1 = arith.constant 0 : i32
    return %c0_i32, %c0_i32_0 : i32, i32
  }
  func.func @transform_3(%arg0: i32) -> (i32, i32) {
    %c0_i32 = arith.constant 0 : i32
    %c0_i32_0 = arith.constant 0 : i32
    return %arg0, %c0_i32 : i32, i32
  }
}

</mosaic_0001>

<bundles_post_ra>
// kernel: tpu_custom_call.1
= control target key start
LH: loop header
LB: loop body
LE: loop exit
PB: predicated region body
PF: predicated region fallthrough
CT: control target
= control target key end

     0   :  { %8 = vsyncpa [#allocation4], 0  ;;  %s1372_s0 = inlined_call_operand.hbm [shape: f32[2,16], index: 0, kind: input, shape index: {}]   ;;  %s1373_s1 = inlined_call_operand.hbm [shape: f32[1,512], index: 1, kind: input, shape index: {}]   ;;  %s1374_s2 = inlined_call_operand.vmem [shape: f32[1,512], index: 2, kind: input, shape index: {}]   ;;  %s1375_s3 = inlined_call_operand.hbm [shape: f32[2,512], index: 3, kind: output, shape index: {}]  }
   0x1   :  { %9 = vsyncpa [#allocation7], 0 }
   0x2   :  { %10 = vsyncpa [#allocation5], 0  ;;  %s886_s12 = smov [#allocation3]   ;;  %s887_s14 = smov [#allocation6]  }
   0x3   :  { %s17_s13 = sshll.u32 %s886_s12, 4  ;;  %s27_s15 = sshll.u32 %s887_s14, 4  ;;  %s18_s13 = int_to_ptr.vmem [resolvable:$true] %s17_s13  ;;  %s28_s15 = int_to_ptr.vmem [resolvable:$true] %s27_s15 }
   0x4   :  { %s814_s18 = scalar_lea.hbm %s1372_s0, 32 }
   0x5   :  { %p815_p0 = scmp.ne.s32.totalorder %s1372_s0, %s814_s18  ;;  %p818_p1 = scmp.lt.u32.totalorder %s814_s18, %s1372_s0 }
   0x7   :  { %p820_p2 = pnand %p818_p1, %p815_p0 }
   0x9   :  { %823 = shalt.err (!%p820_p2)
}
   0xa   :  { %s824_s23 = scalar_lea.vmem %s18_s13, 32  ;;  %p829_p4 = scmp.lt.s32.totalorder %s18_s13, %s18_s13 }
   0xb   :  { %p825_p3 = scmp.ne.s32.totalorder %s18_s13, %s824_s23  ;;  %p830_p5 = scmp.lt.s32.totalorder %s824_s23, %s824_s23 }
   0xd   :  { %p831_p6 = por %p830_p5, %p829_p4 }
   0xf   :  { %p832_p7 = pnand %p831_p6, %p825_p3 }
  0x11   :  { %835 = shalt.err (!%p832_p7)
}
  0x12   :  { %20 = dma.hbm_to_vmem [thread:$0]  %s1372_s0, 32, %s18_s13, [#allocation4]  }
  0x13   :  { %s836_s28 = scalar_lea.hbm %s1373_s1, 64 }
  0x14   :  { %p837_p8 = scmp.ne.s32.totalorder %s1373_s1, %s836_s28  ;;  %p840_p9 = scmp.lt.u32.totalorder %s836_s28, %s1373_s1 }
  0x16   :  { %p842_p10 = pnand %p840_p9, %p837_p8 }
  0x18   :  { %845 = shalt.err (!%p842_p10)
}
  0x19   :  { %s846_s6 = scalar_lea.vmem %s28_s15, 64  ;;  %p851_p12 = scmp.lt.s32.totalorder %s28_s15, %s28_s15 }
  0x1a   :  { %p847_p11 = scmp.ne.s32.totalorder %s28_s15, %s846_s6  ;;  %p852_p13 = scmp.lt.s32.totalorder %s846_s6, %s846_s6 }
  0x1c   :  { %p853_p0 = por %p852_p13, %p851_p12 }
  0x1e   :  { %p854_p1 = pnand %p853_p0, %p847_p11 }
  0x20   :  { %857 = shalt.err (!%p854_p1)
}
  0x21   :  { %30 = dma.hbm_to_vmem [thread:$0]  %s1373_s1, 64, %s28_s15, [#allocation7]  }
  0x22   :  { %880 = dma.done.wait [#allocation4], 32  }
  0x23   :  { %881 = vsyncadd [#allocation4], 4294967264 }
  0x24   :  { %882 = dma.done.wait [#allocation7], 64  }
  0x25   :  { %883 = vsyncadd [#allocation7], 4294967232  ;;  %v44_v0 = vlaneseq  ;;  %v888_v1 = vmov 0.0   ;;  %v889_v3 = vmov 1983009808   ;;  %vm41_vm1 = vcmask 123904  }
  0x26   :  { %39 = vst [vmem:[#allocation2] sm:$0xff] %v888_v1  ;;  %v64_v4 = vunpack.c.l.s4 %v889_v3  ;;  %v40_v7 = vld [vmem:[#allocation3] sm:$0x3]  ;;  %s890_s1 = smov 16   ;;  %s891_s8 = smov 32  }
  0x27   :  { %v944_v2 = vand.u32 127, %v44_v0  ;;  %42 = vst.msk [vmem:[#allocation2] sm:$0x3] %vm41_vm1, %v40_v7  ;;  %v949_v9 = vshrl.u32 %v44_v0, 7  ;;  %s892_s9 = smov 64  }
  0x28   :  { %v65_v8 = vunpack.c.0.s8 %v64_v4 }
  0x29   :  { %vm49_vm0 = vcmp.lt.s32.totalorder %v944_v2, 16  ;;  %vm127_vm3 = vcmp.lt.s32.totalorder %v944_v2, 32  ;;  %v217_v7 = vsub.s32 0, %v949_v9  ;;  %vm164_vm8 = vcmp.lt.s32.totalorder %v944_v2, 64 }
  0x2a   :  { %v720_v5 = vsel %vm49_vm0, 1.0, %v888_v1  ;;  %v952_v10 = vsub.s32 %v65_v8, %v949_v9  ;;  %v213_v8 = vld [vmem:[#allocation6] sm:$0xf] }
  0x2b   :  { %v767_v6 = vpack.i.bf16 %v888_v1, %v720_v5  ;;  %vm107_vm2 = vcmp.gt.f32.partialorder %v720_v5, 0.5 }
  0x2d   :  { %768 = vrot.lane.b32.xlu0 %v767_v6, %s890_s1 }
  0x2e   :  { %v43_v11 = vld [vmem:[#allocation2] sm:$0xff] }
  0x2f   :  { %v69_v12 = vrot.slane %v43_v11, %v952_v10  ;;  %v62_v13 = vcombine.high %v43_v11, %v43_v11 }
  0x31   :  { %773 = vrot.lane.b32.xlu0 %v888_v1, %s890_s1  ;;  %83 = vrot.lane.b32.xlu1 %v69_v12, %s890_s1  ;;  %v77_v14 = vcombine.high %v69_v12, %v69_v12  ;;  %v76_v15 = vrot.slane %v62_v13, %v952_v10  ;;  %v221_v13 = vsub.s32 1, %v949_v9 }
  0x33   :  { %v78_v16 = vcombine.high %v76_v15, %v76_v15 }
  0x35   :  { %85 = vrot.lane.b32.xlu0 %v77_v14, %s890_s1  ;;  %89 = vrot.lane.b32.xlu1 %v78_v16, %s890_s1  ;;  %v225_v14 = vsub.s32 2, %v949_v9 }
  0x39   :  { %87 = vrot.lane.b32.xlu1 %v76_v15, %s890_s1  ;;  %v229_v15 = vsub.s32 3, %v949_v9 }
  0x9f   :  { %v769_v17 = vpop.permute.xlu0 %768 }
  0xa0   :  { %v771_v18 = vunpack.i.h.bf16 %v769_v17  ;;  %v770_v19 = vunpack.i.l.bf16 %v769_v17 }
  0xa2   :  { %v105_v21 = vsel %vm49_vm0, %v770_v19, %v771_v18 }
  0xa3   :  { %v774_v20 = vpop.permute.xlu0 %773  ;;  %v116_v27 = vmax.f32 %v105_v21, 0.0  ;;  %v84_v31 = vpop.permute.xlu1 %83 }
  0xa4   :  { %v776_v22 = vunpack.i.h.bf16 %v774_v20  ;;  %v775_v23 = vunpack.i.l.bf16 %v774_v20  ;;  %v218_v20 = vrot.slane %v213_v8, %v217_v7 }
  0xa5   :  { %vm145_vm5 = vcmp.gt.f32.partialorder %v116_v27, 0.5 }
  0xa6   :  { %v103_v24 = vsel %vm49_vm0, %v775_v23, %v776_v22  ;;  %v104_v25 = vsel %vm49_vm0, %v771_v18, %v775_v23  ;;  %v106_v26 = vsel %vm49_vm0, %v776_v22, %v770_v19 }
  0xa7   :  { %v115_v28 = vmax.f32 %v720_v5, %v106_v26  ;;  %v117_v29 = vmax.f32 %v104_v25, 0.0  ;;  %v118_v30 = vmax.f32 %v103_v24, 0.0  ;;  %v86_v34 = vpop.permute.xlu0 %85  ;;  %v90_v35 = vpop.permute.xlu1 %89  ;;  %v239_v25 = vld [vmem:[%s1374_s2] sm:$0xf]  ;;  %s899_s2 = smov [#allocation8]  }
  0xa8   :  { %v94_v36 = vsel %vm49_vm0, %v90_v35, %v84_v31  ;;  %v93_v37 = vsel %vm49_vm0, %v84_v31, %v86_v34  ;;  %v252_v2 = vrot.slane %v239_v25, %v225_v14  ;;  %s710_s12 = sshll.u32 %s899_s2, 4  ;;  %s711_s12 = int_to_ptr.vmem [resolvable:$true] %s710_s12 }
  0xa9   :  { %v782_v32 = vpack.i.bf16 %v116_v27, %v115_v28  ;;  %v777_v33 = vpack.i.bf16 %v118_v30, %v117_v29  ;;  %v111_v38 = vsel %vm107_vm2, %v69_v12, %v94_v36  ;;  %vm144_vm4 = vcmp.gt.f32.partialorder %v115_v28, 0.5  ;;  %s858_s13 = scalar_lea.vmem %s711_s12, 128  ;;  %p863_p3 = scmp.lt.s32.totalorder %s711_s12, %s711_s12 }
  0xaa   :  { %vm146_vm6 = vcmp.gt.f32.partialorder %v117_v29, 0.5  ;;  %vm147_vm7 = vcmp.gt.f32.partialorder %v118_v30, 0.5  ;;  %p859_p2 = scmp.ne.s32.totalorder %s711_s12, %s858_s13  ;;  %p864_p4 = scmp.lt.s32.totalorder %s858_s13, %s858_s13 }
  0xab   :  { %783 = vrot.lane.b32.xlu0 %v782_v32, %s891_s8  ;;  %778 = vrot.lane.b32.xlu1 %v777_v33, %s891_s8  ;;  %v88_v39 = vpop.permute.xlu1 %87  ;;  %v222_v33 = vrot.slane %v213_v8, %v221_v13 }
  0xac   :  { %v91_v40 = vsel %vm49_vm0, %v88_v39, %v90_v35  ;;  %v92_v41 = vsel %vm49_vm0, %v86_v34, %v88_v39  ;;  %v226_v34 = vrot.slane %v213_v8, %v225_v14  ;;  %v230_v35 = vrot.slane %v213_v8, %v229_v15  ;;  %p865_p5 = por %p864_p4, %p863_p3 }
  0xae   :  { %p866_p6 = pnand %p865_p5, %p859_p2 }
  0xaf   :  { %121 = vrot.lane.b32.xlu1 %v93_v37, %s891_s8  ;;  %119 = vrot.lane.b32.xlu0 %v111_v38, %s891_s8 }
  0xb3   :  { %125 = vrot.lane.b32.xlu1 %v91_v40, %s891_s8  ;;  %123 = vrot.lane.b32.xlu0 %v92_v41, %s891_s8 }
 0x11d   :  { %v784_v42 = vpop.permute.xlu0 %783  ;;  %v779_v43 = vpop.permute.xlu1 %778 }
 0x11e   :  { %v786_v44 = vunpack.i.h.bf16 %v784_v42  ;;  %v785_v45 = vunpack.i.l.bf16 %v784_v42  ;;  %v781_v46 = vunpack.i.h.bf16 %v779_v43  ;;  %v780_v47 = vunpack.i.l.bf16 %v779_v43 }
 0x120   :  { %v142_v48 = vsel %vm127_vm3, %v785_v45, %v786_v44  ;;  %v143_v49 = vsel %vm127_vm3, %v781_v46, %v785_v45  ;;  %v140_v50 = vsel %vm127_vm3, %v780_v47, %v781_v46  ;;  %v141_v51 = vsel %vm127_vm3, %v786_v44, %v780_v47 }
 0x121   :  { %v153_v52 = vmax.f32 %v116_v27, %v142_v48  ;;  %v981_v53 = vmax.f32 %v115_v28, %v143_v49  ;;  %v983_v54 = vmax.f32 %v117_v29, %v141_v51  ;;  %v985_v55 = vmax.f32 %v118_v30, %v140_v50  ;;  %v122_v56 = vpop.permute.xlu1 %121  ;;  %v120_v57 = vpop.permute.xlu0 %119 }
 0x122   :  { %v130_v60 = vsel %vm127_vm3, %v120_v57, %v122_v56 }
 0x123   :  { %v787_v58 = vpack.i.bf16 %v153_v52, %v981_v53  ;;  %v792_v59 = vpack.i.bf16 %v985_v55, %v983_v54  ;;  %v149_v1 = vsel %vm145_vm5, %v93_v37, %v130_v60  ;;  %vm182_vm9 = vcmp.gt.f32.partialorder %v153_v52, 0.5 }
 0x124   :  { %vm183_vm10 = vcmp.gt.f32.partialorder %v983_v54, 0.5  ;;  %vm181_vm11 = vcmp.gt.f32.partialorder %v981_v53, 0.5  ;;  %v244_v37 = vrot.slane %v239_v25, %v217_v7  ;;  %vm184_vm12 = vcmp.gt.f32.partialorder %v985_v55, 0.5 }
 0x125   :  { %v126_v61 = vpop.permute.xlu1 %125  ;;  %788 = vrot.lane.b32.xlu0 %v787_v58, %s892_s9  ;;  %793 = vrot.lane.b32.xlu1 %v792_v59, %s892_s9  ;;  %v124_v63 = vpop.permute.xlu0 %123 }
 0x126   :  { %v131_v62 = vsel %vm127_vm3, %v126_v61, %v120_v57  ;;  %v128_v3 = vsel %vm127_vm3, %v124_v63, %v126_v61  ;;  %v129_v4 = vsel %vm127_vm3, %v122_v56, %v124_v63 }
 0x127   :  { %v994_v0 = vsel %vm144_vm4, %v111_v38, %v131_v62  ;;  %v150_v5 = vsel %vm146_vm6, %v92_v41, %v129_v4  ;;  %v151_v6 = vsel %vm147_vm7, %v91_v40, %v128_v3  ;;  %v248_v38 = vrot.slane %v239_v25, %v221_v13 }
 0x129   :  { %156 = vrot.lane.b32.xlu0 %v994_v0, %s892_s9  ;;  %158 = vrot.lane.b32.xlu1 %v149_v1, %s892_s9 }
 0x12d   :  { %160 = vrot.lane.b32.xlu0 %v150_v5, %s892_s9  ;;  %162 = vrot.lane.b32.xlu1 %v151_v6, %s892_s9 }
 0x197   :  { %v789_v11 = vpop.permute.xlu0 %788  ;;  %v794_v12 = vpop.permute.xlu1 %793 }
 0x198   :  { %v791_v16 = vunpack.i.h.bf16 %v789_v11  ;;  %v790_v17 = vunpack.i.l.bf16 %v789_v11  ;;  %v796_v18 = vunpack.i.h.bf16 %v794_v12  ;;  %v795_v19 = vunpack.i.l.bf16 %v794_v12 }
 0x19a   :  { %v179_v21 = vsel %vm164_vm8, %v790_v17, %v791_v16  ;;  %v180_v22 = vsel %vm164_vm8, %v796_v18, %v790_v17  ;;  %v177_v23 = vsel %vm164_vm8, %v795_v19, %v796_v18  ;;  %v178_v24 = vsel %vm164_vm8, %v791_v16, %v795_v19 }
 0x19b   :  { %v190_v26 = vmax.f32 %v153_v52, %v179_v21  ;;  %v189_v27 = vmax.f32 %v981_v53, %v180_v22  ;;  %v191_v28 = vmax.f32 %v983_v54, %v178_v24  ;;  %v192_v29 = vmax.f32 %v985_v55, %v177_v23  ;;  %v157_v30 = vpop.permute.xlu0 %156  ;;  %v159_v31 = vpop.permute.xlu1 %158 }
 0x19c   :  { %v167_v32 = vsel %vm164_vm8, %v157_v30, %v159_v31 }
 0x19d   :  { %v186_v36 = vsel %vm182_vm9, %v149_v1, %v167_v32  ;;  %vm195_vm13 = vcmp.gt.f32.partialorder %v191_v28, 0.5  ;;  %vm194_vm14 = vcmp.gt.f32.partialorder %v190_v26, 0.5  ;;  %v201_v39 = vmax.f32 %v189_v27, %v192_v29 }
 0x19e   :  { %v202_v40 = vmax.f32 %v190_v26, %v189_v27  ;;  %vm193_vm15 = vcmp.gt.f32.partialorder %v189_v27, 0.5  ;;  %vm196_vm0 = vcmp.gt.f32.partialorder %v192_v29, 0.5  ;;  %v203_v43 = vmax.f32 %v191_v28, %v190_v26 }
 0x19f   :  { %v161_v41 = vpop.permute.xlu0 %160  ;;  %v163_v42 = vpop.permute.xlu1 %162  ;;  %v204_v44 = vmax.f32 %v192_v29, %v191_v28  ;;  %vm205_vm1 = vcmp.gt.f32.partialorder %v201_v39, 0.5  ;;  %v256_v1 = vrot.slane %v239_v25, %v229_v15 }
 0x1a0   :  { %v166_v45 = vsel %vm164_vm8, %v159_v31, %v161_v41  ;;  %v165_v46 = vsel %vm164_vm8, %v161_v41, %v163_v42  ;;  %v168_v47 = vsel %vm164_vm8, %v163_v42, %v157_v30  ;;  %vm206_vm2 = vcmp.gt.f32.partialorder %v202_v40, 0.5 }
 0x1a1   :  { %v187_v48 = vsel %vm183_vm10, %v150_v5, %v166_v45  ;;  %v185_v49 = vsel %vm181_vm11, %v994_v0, %v168_v47  ;;  %v188_v50 = vsel %vm184_vm12, %v151_v6, %v165_v46  ;;  %vm207_vm3 = vcmp.gt.f32.partialorder %v203_v43, 0.5 }
 0x1a2   :  { %v199_v51 = vsel %vm195_vm13, %v187_v48, %v186_v36  ;;  %v197_v52 = vsel %vm193_vm15, %v185_v49, %v188_v50  ;;  %v198_v56 = vsel %vm194_vm14, %v186_v36, %v185_v49  ;;  %v200_v57 = vsel %vm196_vm0, %v188_v50, %v187_v48 }
 0x1a3   :  { %v209_v58 = vsel %vm205_vm1, %v197_v52, %v199_v51  ;;  %v210_v59 = vsel %vm206_vm2, %v198_v56, %v200_v57  ;;  %vm208_vm4 = vcmp.gt.f32.partialorder %v204_v44, 0.5  ;;  %v211_v54 = vsel %vm207_vm3, %v199_v51, %v197_v52 }
 0x1a4   :  { %v235_v60 = vmul.f32 %v218_v20, %v209_v58  ;;  %v236_v61 = vmul.f32 %v222_v33, %v210_v59  ;;  %v212_v53 = vsel %vm208_vm4, %v200_v57, %v198_v56  ;;  %v237_v62 = vmul.f32 %v226_v34, %v211_v54 }
 0x1a5   :  { %v238_v3 = vmul.f32 %v230_v35, %v212_v53  ;;  %v893_v36 = vmov 683565275   ;;  %v895_v41 = vmov 2131351028   ;;  %v896_v46 = vmov 2102212464  }
 0x1a6   :  { %v1043_v63 = vadd.f32 %v244_v37, %v235_v60  ;;  %v1045_v55 = vadd.f32 %v248_v38, %v236_v61  ;;  %v1047_v0 = vadd.f32 %v252_v2, %v237_v62  ;;  %v894_v38 = vmov 2475754826  }
 0x1a7   :  { %v1056_v14 = vadd.f32 %v256_v1, %v238_v3  ;;  %v897_v51 = vmov 920167782   ;;  %v898_v58 = vmov 1326507024  }
 0x1a8   :  { %v268_v4 = vand.u32 2139095040, %v1043_v63  ;;  %v372_v5 = vand.u32 2139095040, %v1045_v55  ;;  %v476_v6 = vand.u32 2139095040, %v1047_v0  ;;  %v265_v7 = vand.u32 2147483647, %v1043_v63 }
 0x1a9   :  { %v369_v8 = vand.u32 2147483647, %v1045_v55  ;;  %v580_v22 = vand.u32 2139095040, %v1056_v14  ;;  %v473_v31 = vand.u32 2147483647, %v1047_v0 }
 0x1aa   :  { %v269_v11 = vshrl.u32 %v268_v4, 23  ;;  %v373_v12 = vshrl.u32 %v372_v5, 23  ;;  %v477_v13 = vshrl.u32 %v476_v6, 23  ;;  %v272_v15 = vand.u32 8388607, %v265_v7 }
 0x1ab   :  { %v376_v18 = vand.u32 8388607, %v369_v8  ;;  %v1065_v30 = vshrl.u32 %v580_v22, 23 }
 0x1ac   :  { %v721_v16 = vadd.s32 4294967169, %v269_v11  ;;  %v725_v17 = vadd.s32 4294967169, %v373_v12  ;;  %v729_v9 = vadd.s32 4294967169, %v477_v13  ;;  %v273_v25 = vor.u32 8388608, %v272_v15 }
 0x1ad   :  { %v377_v26 = vor.u32 8388608, %v376_v18 }
 0x1ae   :  { %v275_v19 = vadd.s32 1, %v721_v16  ;;  %v379_v20 = vadd.s32 1, %v725_v17  ;;  %v483_v21 = vadd.s32 1, %v729_v9  ;;  %v1070_v34 = vshll.u32 %v273_v25, 8 }
 0x1af   :  { %v1072_v35 = vshll.u32 %v377_v26, 8 }
 0x1b0   :  { %vm276_vm5 = vcmp.gt.s32.totalorder %v275_v19, 0  ;;  %vm380_vm6 = vcmp.gt.s32.totalorder %v379_v20, 0  ;;  %vm484_vm7 = vcmp.gt.s32.totalorder %v483_v21, 0 }
 0x1b1   :  { %v277_v23 = vsel %vm276_vm5, %v275_v19, 0  ;;  %v381_v24 = vsel %vm380_vm6, %v379_v20, 0  ;;  %v1079_v44 = vsel %vm484_vm7, %v483_v21, 0 }
 0x1b2   :  { %v279_v27 = vand.u32 31, %v277_v23  ;;  %v1063_v28 = vand.u32 31, %v381_v24  ;;  %v278_v32 = vshrl.u32 %v277_v23, 5  ;;  %v1068_v33 = vshrl.u32 %v381_v24, 5 }
 0x1b3   :  { %v1089_v1 = vand.u32 31, %v1079_v44 }
 0x1b4   :  { %v280_v29 = vsub.s32 32, %v279_v27  ;;  %v282_v37 = vshll.u32 %v893_v36, %v279_v27  ;;  %v285_v40 = vshll.u32 %v894_v38, %v279_v27  ;;  %v384_v43 = vsub.s32 32, %v1063_v28 }
 0x1b5   :  { %v288_v45 = vshll.u32 %v895_v41, %v279_v27  ;;  %v291_v50 = vshll.u32 %v896_v46, %v279_v27  ;;  %v294_v2 = vshll.u32 %v897_v51, %v279_v27  ;;  %vm297_vm8 = vcmp.lt.s32.totalorder %v278_v32, 1 }
 0x1b6   :  { %v283_v39 = vshrl.u32 %v894_v38, %v280_v29  ;;  %v286_v42 = vshrl.u32 %v895_v41, %v280_v29  ;;  %v289_v47 = vshrl.u32 %v896_v46, %v280_v29  ;;  %v292_v52 = vshrl.u32 %v897_v51, %v280_v29 }
 0x1b7   :  { %v281_v56 = vshrl.u32 %v893_v36, %v280_v29  ;;  %v295_v59 = vshrl.u32 %v898_v58, %v280_v29  ;;  %vm299_vm9 = vcmp.lt.s32.totalorder %v278_v32, 3  ;;  %vm300_vm10 = vcmp.lt.s32.totalorder %v278_v32, 4 }
 0x1b8   :  { %v284_v48 = vor.u32 %v283_v39, %v282_v37  ;;  %v287_v49 = vor.u32 %v286_v42, %v285_v40  ;;  %v290_v57 = vor.u32 %v289_v47, %v288_v45  ;;  %v293_v54 = vor.u32 %v292_v52, %v291_v50 }
 0x1b9   :  { %v296_v60 = vor.u32 %v295_v59, %v294_v2  ;;  %vm298_vm11 = vcmp.lt.s32.totalorder %v278_v32, 2  ;;  %v387_v12 = vshrl.u32 %v894_v38, %v384_v43  ;;  %v386_v9 = vshll.u32 %v893_v36, %v1063_v28 }
 0x1ba   :  { %v301_v61 = vsel %vm297_vm8, %v281_v56, %v284_v48  ;;  %v302_v53 = vsel %vm300_vm10, %v290_v57, 2102212464  ;;  %v305_v62 = vsel %vm297_vm8, %v284_v48, %v287_v49  ;;  %v306_v4 = vsel %vm300_vm10, %v293_v54, 920167782 }
 0x1bb   :  { %v303_v3 = vsel %vm299_vm9, %v287_v49, %v302_v53  ;;  %v309_v5 = vsel %vm297_vm8, %v287_v49, %v290_v57  ;;  %v307_v6 = vsel %vm299_vm9, %v290_v57, %v306_v4  ;;  %v310_v11 = vsel %vm300_vm10, %v296_v60, 1326507024 }
 0x1bc   :  { %v304_v13 = vsel %vm298_vm11, %v301_v61, %v303_v3  ;;  %v308_v16 = vsel %vm298_vm11, %v305_v62, %v307_v6  ;;  %v311_v17 = vsel %vm299_vm9, %v293_v54, %v310_v11  ;;  %v389_v20 = vshll.u32 %v894_v38, %v1063_v28 }
 0x1bd   :  { %v312_v15 = vsel %vm298_vm11, %v309_v5, %v311_v17  ;;  %v1098_v18 = vmul.u32.u64.low %v1070_v34, %v308_v16  ;;  %v1099_v19 = vmul.u32.u64.high %v1070_v34, %v308_v16, %v1098_v18  ;;  %v388_v23 = vor.u32 %v387_v12, %v386_v9 }
 0x1be   :  { %v1105_v21 = vmul.u32.u64.low %v1070_v34, %v312_v15  ;;  %v1106_v22 = vmul.u32.u64.high %v1070_v34, %v312_v15, %v1105_v21  ;;  %v390_v24 = vshrl.u32 %v895_v41, %v384_v43  ;;  %v392_v25 = vshll.u32 %v895_v41, %v1063_v28 }
 0x1bf   :  { %v393_v26 = vshrl.u32 %v896_v46, %v384_v43  ;;  %v395_v27 = vshll.u32 %v896_v46, %v1063_v28  ;;  %v396_v29 = vshrl.u32 %v897_v51, %v384_v43  ;;  %v1116_v32 = vsub.s32 32, %v1089_v1 }
 0x1c0   :  { %v391_v37 = vor.u32 %v390_v24, %v389_v20  ;;  %v398_v39 = vshll.u32 %v897_v51, %v1063_v28  ;;  %v399_v40 = vshrl.u32 %v898_v58, %v384_v43  ;;  %v320_v42 = vmul.u32 %v1070_v34, %v304_v13 }
 0x1c1   :  { %v323_v45 = vadd.s32 1, %v1099_v19  ;;  %v394_v47 = vor.u32 %v393_v26, %v392_v25  ;;  %v397_v48 = vor.u32 %v396_v29, %v395_v27  ;;  %vm322_vm12 = vc.u32 %v1106_v22, %v1098_v18 }
 0x1c2   :  { %v400_v49 = vor.u32 %v399_v40, %v398_v39  ;;  %vm401_vm13 = vcmp.lt.s32.totalorder %v1068_v33, 1  ;;  %vm404_vm14 = vcmp.lt.s32.totalorder %v1068_v33, 4  ;;  %v385_v28 = vshrl.u32 %v893_v36, %v384_v43 }
 0x1c3   :  { %v324_v50 = vsel %vm322_vm12, %v323_v45, %v1099_v19  ;;  %v406_v52 = vsel %vm404_vm14, %v394_v47, 2102212464  ;;  %v409_v56 = vsel %vm401_vm13, %v388_v23, %v391_v37  ;;  %vm403_vm15 = vcmp.lt.s32.totalorder %v1068_v33, 3 }
 0x1c4   :  { %v325_v57 = vadd.s32 %v324_v50, %v320_v42  ;;  %v410_v34 = vsel %vm404_vm14, %v397_v48, 920167782  ;;  %v413_v2 = vsel %vm401_vm13, %v391_v37, %v394_v47  ;;  %vm402_vm0 = vcmp.lt.s32.totalorder %v1068_v33, 2 }
 0x1c5   :  { %v405_v59 = vsel %vm401_vm13, %v385_v28, %v388_v23  ;;  %v411_v54 = vsel %vm403_vm15, %v394_v47, %v410_v34  ;;  %v414_v60 = vsel %vm404_vm14, %v400_v49, 1326507024  ;;  %v407_v53 = vsel %vm403_vm15, %v391_v37, %v406_v52 }
 0x1c6   :  { %v326_v61 = vadd.s32 536870912, %v325_v57  ;;  %v412_v62 = vsel %vm402_vm0, %v409_v56, %v411_v54  ;;  %v415_v3 = vsel %vm403_vm15, %v397_v48, %v414_v60  ;;  %v733_v33 = vadd.s32 4294967169, %v1065_v30 }
 0x1c7   :  { %v416_v4 = vsel %vm402_vm0, %v413_v2, %v415_v3  ;;  %v1132_v5 = vmul.u32.u64.low %v1072_v35, %v412_v62  ;;  %v1133_v43 = vmul.u32.u64.high %v1072_v35, %v412_v62, %v1132_v5  ;;  %v408_v13 = vsel %vm402_vm0, %v405_v59, %v407_v53 }
 0x1c8   :  { %v1136_v6 = vshrl.u32 %v326_v61, 30  ;;  %v1139_v11 = vmul.u32.u64.low %v1072_v35, %v416_v4  ;;  %v1140_v12 = vmul.u32.u64.high %v1072_v35, %v416_v4, %v1139_v11  ;;  %v1144_v16 = vshrl.u32 %v1079_v44, 5 }
 0x1c9   :  { %v480_v9 = vand.u32 8388607, %v473_v31  ;;  %v494_v15 = vshrl.u32 %v895_v41, %v1116_v32  ;;  %v427_v19 = vadd.s32 1, %v1133_v43  ;;  %v497_v20 = vshrl.u32 %v896_v46, %v1116_v32 }
 0x1ca   :  { %v328_v17 = vshll.u32 %v1136_v6, 30  ;;  %v499_v30 = vshll.u32 %v896_v46, %v1089_v1  ;;  %v500_v44 = vshrl.u32 %v897_v51, %v1116_v32  ;;  %v424_v23 = vmul.u32 %v1072_v35, %v408_v13 }
 0x1cb   :  { %vm426_vm1 = vc.u32 %v1140_v12, %v1132_v5  ;;  %v491_v24 = vshrl.u32 %v894_v38, %v1116_v32  ;;  %v493_v26 = vshll.u32 %v894_v38, %v1089_v1  ;;  %v496_v27 = vshll.u32 %v895_v41, %v1089_v1 }
 0x1cc   :  { %v1158_v21 = vsub.s32 %v325_v57, %v328_v17  ;;  %v428_v25 = vsel %vm426_vm1, %v427_v19, %v1133_v43  ;;  %v501_v29 = vor.u32 %v500_v44, %v499_v30  ;;  %v490_v39 = vshll.u32 %v893_v36, %v1089_v1 }
 0x1cd   :  { %v429_v37 = vadd.s32 %v428_v25, %v424_v23  ;;  %v502_v35 = vshll.u32 %v897_v51, %v1089_v1  ;;  %v503_v40 = vshrl.u32 %v898_v58, %v1116_v32  ;;  %v495_v45 = vor.u32 %v494_v15, %v493_v26 }
 0x1ce   :  { %v331_v42 = vsub.s32 0, %v1158_v21  ;;  %v498_v47 = vor.u32 %v497_v20, %v496_v27  ;;  %v492_v49 = vor.u32 %v491_v24, %v490_v39  ;;  %vm508_vm2 = vcmp.lt.s32.totalorder %v1144_v16, 4 }
 0x1cf   :  { %v430_v48 = vadd.s32 536870912, %v429_v37  ;;  %v504_v50 = vor.u32 %v503_v40, %v502_v35  ;;  %v587_v28 = vadd.s32 1, %v733_v33  ;;  %v514_v52 = vsel %vm508_vm2, %v501_v29, 920167782 }
 0x1d0   :  { %v481_v56 = vor.u32 8388608, %v480_v9  ;;  %vm505_vm3 = vcmp.lt.s32.totalorder %v1144_v16, 1  ;;  %v722_v1 = vmin.u32 %v331_v42, %v1158_v21  ;;  %vm507_vm4 = vcmp.lt.s32.totalorder %v1144_v16, 3 }
 0x1d1   :  { %v1182_v57 = vshrl.u32 %v430_v48, 30  ;;  %v517_v34 = vsel %vm505_vm3, %v495_v45, %v498_v47  ;;  %v513_v2 = vsel %vm505_vm3, %v492_v49, %v495_v45  ;;  %v515_v59 = vsel %vm507_vm4, %v498_v47, %v514_v52 }
 0x1d2   :  { %v518_v54 = vsel %vm508_vm2, %v504_v50, 1326507024  ;;  %vm588_vm5 = vcmp.gt.s32.totalorder %v587_v28, 0  ;;  %vm506_vm6 = vcmp.lt.s32.totalorder %v1144_v16, 2  ;;  %v510_v53 = vsel %vm508_vm2, %v498_v47, 2102212464 }
 0x1d3   :  { %v432_v60 = vshll.u32 %v1182_v57, 30  ;;  %v519_v61 = vsel %vm507_vm4, %v501_v29, %v518_v54  ;;  %v333_v3 = vclz %v722_v1  ;;  %v516_v43 = vsel %vm506_vm6, %v513_v2, %v515_v59 }
 0x1d4   :  { %v520_v62 = vsel %vm506_vm6, %v517_v34, %v519_v61  ;;  %v521_v11 = vshll.u32 %v481_v56, 8  ;;  %v589_v33 = vsel %vm588_vm5, %v587_v28, 0  ;;  %v489_v13 = vshrl.u32 %v893_v36, %v1116_v32 }
 0x1d5   :  { %v1201_v4 = vsub.s32 %v429_v37, %v432_v60  ;;  %v511_v20 = vsel %vm507_vm4, %v495_v45, %v510_v53  ;;  %v591_v23 = vand.u32 31, %v589_v33  ;;  %v723_v24 = vadd.s32 4294967294, %v333_v3 }
 0x1d6   :  { %v1208_v9 = vmul.u32.u64.low %v521_v11, %v520_v62  ;;  %v1209_v15 = vmul.u32.u64.high %v521_v11, %v520_v62, %v1208_v9  ;;  %v509_v19 = vsel %vm505_vm3, %v489_v13, %v492_v49  ;;  %v577_v45 = vand.u32 2147483647, %v1056_v14 }
 0x1d7   :  { %v435_v17 = vsub.s32 0, %v1201_v4  ;;  %v1215_v30 = vmul.u32.u64.low %v521_v11, %v516_v43  ;;  %v1216_v44 = vmul.u32.u64.high %v521_v11, %v516_v43, %v1215_v30  ;;  %v512_v32 = vsel %vm506_vm6, %v509_v19, %v511_v20 }
 0x1d8   :  { %v592_v27 = vsub.s32 32, %v591_v23  ;;  %vm724_vm8 = vcmp.lt.s32.totalorder %v723_v24, 0  ;;  %v528_v37 = vmul.u32 %v521_v11, %v512_v32  ;;  %v590_v48 = vshrl.u32 %v589_v33, 5 }
 0x1d9   :  { %v726_v25 = vmin.u32 %v435_v17, %v1201_v4  ;;  %vm530_vm7 = vc.u32 %v1209_v15, %v1215_v30  ;;  %v531_v29 = vadd.s32 1, %v1216_v44  ;;  %v1226_v35 = vsel %vm724_vm8, 0, %v723_v24 }
 0x1da   :  { %v595_v16 = vshrl.u32 %v894_v38, %v592_v27  ;;  %v598_v47 = vshrl.u32 %v895_v41, %v592_v27  ;;  %v604_v50 = vshrl.u32 %v897_v51, %v592_v27  ;;  %v341_v28 = vsub.s32 4294967266, %v1226_v35 }
 0x1db   :  { %v437_v26 = vclz %v726_v25  ;;  %v532_v39 = vsel %vm530_vm7, %v531_v29, %v1216_v44  ;;  %v594_v52 = vshll.u32 %v893_v36, %v591_v23  ;;  %v597_v56 = vshll.u32 %v894_v38, %v591_v23 }
 0x1dc   :  { %v533_v42 = vadd.s32 %v532_v39, %v528_v37  ;;  %v601_v1 = vshrl.u32 %v896_v46, %v592_v27  ;;  %v603_v2 = vshll.u32 %v896_v46, %v591_v23  ;;  %v607_v59 = vshrl.u32 %v898_v58, %v592_v27 }
 0x1dd   :  { %v727_v40 = vadd.s32 4294967294, %v437_v26  ;;  %v584_v54 = vand.u32 8388607, %v577_v45  ;;  %v596_v60 = vor.u32 %v595_v16, %v594_v52  ;;  %v599_v61 = vor.u32 %v598_v47, %v597_v56 }
 0x1de   :  { %v534_v49 = vadd.s32 536870912, %v533_v42  ;;  %v600_v53 = vshll.u32 %v895_v41, %v591_v23  ;;  %v605_v3 = vor.u32 %v604_v50, %v603_v2  ;;  %v606_v38 = vshll.u32 %v897_v51, %v591_v23 }
 0x1df   :  { %vm728_vm9 = vcmp.lt.s32.totalorder %v727_v40, 0  ;;  %vm609_vm10 = vcmp.lt.s32.totalorder %v590_v48, 1  ;;  %v342_v46 = vadd.s32 127, %v341_v28  ;;  %v585_v58 = vor.u32 8388608, %v584_v54 }
 0x1e0   :  { %v1236_v34 = vshrl.u32 %v534_v49, 30  ;;  %v440_v43 = vsel %vm728_vm9, 0, %v727_v40  ;;  %v602_v11 = vor.u32 %v601_v1, %v600_v53  ;;  %v608_v13 = vor.u32 %v607_v59, %v606_v38 }
 0x1e1   :  { %vm612_vm11 = vcmp.lt.s32.totalorder %v590_v48, 4  ;;  %v617_v17 = vsel %vm609_vm10, %v596_v60, %v599_v61  ;;  %v445_v9 = vsub.s32 4294967266, %v440_v43  ;;  %vm611_vm12 = vcmp.lt.s32.totalorder %v590_v48, 3 }
 0x1e2   :  { %v536_v62 = vshll.u32 %v1236_v34, 30  ;;  %v618_v41 = vsel %vm612_vm11, %v605_v3, 920167782  ;;  %v593_v20 = vshrl.u32 %v893_v36, %v592_v27  ;;  %vm610_vm13 = vcmp.lt.s32.totalorder %v590_v48, 2 }
 0x1e3   :  { %v614_v51 = vsel %vm612_vm11, %v602_v11, 2102212464  ;;  %v619_v44 = vsel %vm611_vm12, %v602_v11, %v618_v41  ;;  %v621_v25 = vsel %vm609_vm10, %v599_v61, %v602_v11  ;;  %v622_v32 = vsel %vm612_vm11, %v608_v13, 1326507024 }
 0x1e4   :  { %v1245_v33 = vsub.s32 %v533_v42, %v536_v62  ;;  %v620_v24 = vsel %vm610_vm13, %v617_v17, %v619_v44  ;;  %v321_v26 = vadd.s32 %v1098_v18, %v1106_v22  ;;  %v623_v29 = vsel %vm611_vm12, %v605_v3, %v622_v32 }
 0x1e5   :  { %v625_v37 = vshll.u32 %v585_v58, 8  ;;  %v337_v39 = vsub.s32 32, %v1226_v35  ;;  %v446_v36 = vadd.s32 127, %v445_v9  ;;  %v613_v40 = vsel %vm609_vm10, %v593_v20, %v596_v60 }
 0x1e6   :  { %v539_v19 = vsub.s32 0, %v1245_v33  ;;  %v615_v42 = vsel %vm611_vm12, %v599_v61, %v614_v51  ;;  %v624_v16 = vsel %vm610_vm13, %v621_v25, %v623_v29  ;;  %v343_v50 = vshll.u32 %v342_v46, 23 }
 0x1e7   :  { %v1261_v47 = vmul.u32.u64.low %v625_v37, %v620_v24  ;;  %v1262_v49 = vmul.u32.u64.high %v625_v37, %v620_v24, %v1261_v47  ;;  %v1265_v18 = vmul.u32.u64.low %v625_v37, %v624_v16  ;;  %v1266_v22 = vmul.u32.u64.high %v625_v37, %v624_v16, %v1265_v18 }
 0x1e8   :  { %v730_v23 = vmin.u32 %v539_v19, %v1245_v33  ;;  %v441_v52 = vsub.s32 32, %v440_v43  ;;  %v339_v56 = vshrl.u32 %v321_v26, %v337_v39  ;;  %v616_v1 = vsel %vm610_vm13, %v613_v40, %v615_v42 }
 0x1e9   :  { %v425_v2 = vadd.s32 %v1132_v5, %v1140_v12  ;;  %v447_v59 = vshll.u32 %v446_v36, 23  ;;  %v635_v60 = vadd.s32 1, %v1262_v49  ;;  %v338_v61 = vshll.u32 %v1158_v21, %v1226_v35 }
 0x1ea   :  { %v541_v27 = vclz %v730_v23  ;;  %v344_v53 = vor.u32 4788187, %v343_v50  ;;  %v632_v11 = vmul.u32 %v625_v37, %v616_v1  ;;  %vm634_vm15 = vc.u32 %v1266_v22, %v1261_v47 }
 0x1eb   :  { %v443_v3 = vshrl.u32 %v425_v2, %v441_v52  ;;  %v340_v48 = vor.u32 %v339_v56, %v338_v61  ;;  %v636_v46 = vsel %vm634_vm15, %v635_v60, %v1262_v49  ;;  %v442_v5 = vshll.u32 %v1201_v4, %v440_v43 }
 0x1ec   :  { %v731_v28 = vadd.s32 4294967294, %v541_v27  ;;  %v448_v12 = vor.u32 4788187, %v447_v59  ;;  %v529_v58 = vadd.s32 %v1215_v30, %v1209_v15  ;;  %v637_v17 = vadd.s32 %v636_v46, %v632_v11 }
 0x1ed   :  { %v345_v21 = vand.u32 2147483647, %v344_v53  ;;  %v444_v9 = vor.u32 %v443_v3, %v442_v5  ;;  %v347_v20 = vcvt.s32.f32 %v340_v48  ;;  %vm267_vm0 = vcmp.lt.s32.totalorder %v1043_v63, 0 }
 0x1ee   :  { %vm732_vm14 = vcmp.lt.s32.totalorder %v731_v28, 0  ;;  %v638_v41 = vadd.s32 536870912, %v637_v17  ;;  %v449_v51 = vand.u32 2147483647, %v448_v12  ;;  %vm1289_vm1 = vcmp.le.f32.partialorder %v265_v7, 0.7853982 }
 0x1ef   :  { %v544_v54 = vsel %vm732_vm14, 0, %v731_v28  ;;  %v348_v25 = vmul.f32 %v347_v20, %v345_v21  ;;  %v451_v32 = vcvt.s32.f32 %v444_v9  ;;  %vm371_vm2 = vcmp.lt.s32.totalorder %v1045_v55, 0 }
 0x1f0   :  { %v549_v62 = vsub.s32 4294967266, %v544_v54  ;;  %v545_v38 = vsub.s32 32, %v544_v54  ;;  %v546_v44 = vshll.u32 %v1245_v33, %v544_v54  ;;  %v1281_v24 = vshrl.u32 %v638_v41, 30 }
 0x1f1   :  { %v452_v26 = vmul.f32 %v451_v32, %v449_v51  ;;  %v349_v29 = vxor.u32 2147483648, %v348_v25  ;;  %v351_v52 = vsub.s32 4, %v1136_v6  ;;  %vm1302_vm3 = vcmp.le.f32.partialorder %v369_v8, 0.7853982 }
 0x1f2   :  { %v550_v13 = vadd.s32 127, %v549_v62  ;;  %v547_v19 = vshrl.u32 %v529_v58, %v545_v38  ;;  %v640_v43 = vshll.u32 %v1281_v24, 30  ;;  %vm475_vm4 = vcmp.lt.s32.totalorder %v1047_v0, 0 }
 0x1f3   :  { %v453_v36 = vxor.u32 2147483648, %v452_v26  ;;  %v350_v33 = vsel %vm267_vm0, %v349_v29, %v348_v25  ;;  %v455_v56 = vsub.s32 4, %v1182_v57  ;;  %v633_v8 = vadd.s32 %v1261_v47, %v1266_v22 }
 0x1f4   :  { %v551_v35 = vshll.u32 %v550_v13, 23  ;;  %v548_v4 = vor.u32 %v547_v19, %v546_v44  ;;  %v641_v30 = vsub.s32 %v637_v17, %v640_v43  ;;  %v353_v49 = vsel %vm1289_vm1, %v1043_v63, %v350_v33 }
 0x1f5   :  { %v454_v50 = vsel %vm371_vm2, %v453_v36, %v452_v26  ;;  %798 = vcosq.f32 %v353_v49  ;;  %vm1317_vm6 = vcmp.le.f32.partialorder %v473_v31, 0.7853982  ;;  %v352_v38 = vsel %vm267_vm0, %v351_v52, %v1136_v6 }
 0x1f6   :  { %v552_v23 = vor.u32 4788187, %v551_v35  ;;  %v555_v37 = vcvt.s32.f32 %v548_v4  ;;  %v643_v39 = vsub.s32 0, %v641_v30  ;;  %v457_v1 = vsel %vm1302_vm3, %v1045_v55, %v454_v50 }
 0x1f7   :  { %800 = vsinq.f32 %v353_v49  ;;  %v456_v47 = vsel %vm371_vm2, %v455_v56, %v1182_v57  ;;  %v559_v22 = vsub.s32 4, %v1236_v34  ;;  %v354_v13 = vsel %vm1289_vm1, 0, %v352_v38 }
 0x1f8   :  { %v553_v15 = vand.u32 2147483647, %v552_v23  ;;  %v734_v40 = vmin.u32 %v643_v39, %v641_v30  ;;  %802 = vcosq.f32 %v457_v1  ;;  %v458_v46 = vsel %vm1302_vm3, 0, %v456_v47 }
 0x1f9   :  { %804 = vsinq.f32 %v457_v1  ;;  %v560_v57 = vsel %vm475_vm4, %v559_v22, %v1236_v34  ;;  %v358_v17 = vadd.s32 3, %v354_v13  ;;  %v462_v21 = vadd.s32 3, %v458_v46 }
 0x1fa   :  { %v556_v27 = vmul.f32 %v555_v37, %v553_v15  ;;  %v645_v42 = vclz %v734_v40  ;;  %v663_v9 = vsub.s32 4, %v1281_v24  ;;  %v562_v41 = vsel %vm1317_vm6, 0, %v560_v57 }
 0x1fb   :  { %v359_v23 = vand.u32 3, %v358_v17  ;;  %v463_v25 = vand.u32 3, %v462_v21  ;;  %vm579_vm7 = vcmp.lt.s32.totalorder %v1056_v14, 0  ;;  %v566_v34 = vadd.s32 3, %v562_v41 }
 0x1fc   :  { %v557_v28 = vxor.u32 2147483648, %v556_v27  ;;  %v735_v18 = vadd.s32 4294967294, %v645_v42  ;;  %vm1344_vm8 = vcmp.le.f32.partialorder %v577_v45, 0.7853982  ;;  %v664_v43 = vsel %vm579_vm7, %v663_v9, %v1281_v24 }
 0x1fd   :  { %v666_v45 = vsel %vm1344_vm8, 0, %v664_v43  ;;  %vm361_vm9 = vcmp.eq.s32.totalorder %v359_v23, 0  ;;  %vm364_vm10 = vcmp.eq.s32.totalorder %v359_v23, 2  ;;  %vm465_vm11 = vcmp.eq.s32.totalorder %v463_v25, 0 }
 0x1fe   :  { %vm736_vm5 = vcmp.lt.s32.totalorder %v735_v18, 0  ;;  %v558_v59 = vsel %vm475_vm4, %v557_v28, %v556_v27  ;;  %vm468_vm12 = vcmp.eq.s32.totalorder %v463_v25, 2  ;;  %v567_v33 = vand.u32 3, %v566_v34 }
 0x1ff   :  { %v648_v2 = vsel %vm736_vm5, 0, %v735_v18  ;;  %v561_v31 = vsel %vm1317_vm6, %v1047_v0, %v558_v59  ;;  %v799_v58 = vpop.eup %798  ;;  %v670_v50 = vadd.s32 3, %v666_v45  ;;  %vm360_vm13 = vcmp.lt.s32.totalorder %v359_v23, 2 }
 0x200   :  { %v649_v54 = vsub.s32 32, %v648_v2  ;;  %v653_v60 = vsub.s32 4294967266, %v648_v2  ;;  %v650_v53 = vshll.u32 %v641_v30, %v648_v2  ;;  %806 = vcosq.f32 %v561_v31 }
 0x201   :  { %808 = vsinq.f32 %v561_v31  ;;  %v801_v19 = vpop.eup %800  ;;  %v365_v15 = vxor.u32 2147483648, %v799_v58  ;;  %vm464_vm14 = vcmp.lt.s32.totalorder %v463_v25, 2  ;;  %vm569_vm15 = vcmp.eq.s32.totalorder %v567_v33, 0 }
 0x202   :  { %v651_v62 = vshrl.u32 %v633_v8, %v649_v54  ;;  %v654_v3 = vadd.s32 127, %v653_v60  ;;  %v803_v20 = vpop.eup %802  ;;  %v362_v26 = vxor.u32 2147483648, %v801_v19  ;;  %vm572_vm0 = vcmp.eq.s32.totalorder %v567_v33, 2 }
 0x203   :  { %v805_v44 = vpop.eup %804  ;;  %v469_v30 = vxor.u32 2147483648, %v803_v20  ;;  %v366_v27 = vsel %vm364_vm10, %v365_v15, %v801_v19  ;;  %v671_v56 = vand.u32 3, %v670_v50  ;;  %vm357_vm1 = vweird.f32 %v1043_v63 }
 0x204   :  { %v652_v11 = vor.u32 %v651_v62, %v650_v53  ;;  %v655_v48 = vshll.u32 %v654_v3, 23  ;;  %v466_v39 = vxor.u32 2147483648, %v805_v44  ;;  %v363_v24 = vsel %vm361_vm9, %v799_v58, %v362_v26 }
 0x205   :  { %v470_v40 = vsel %vm468_vm12, %v469_v30, %v805_v44  ;;  %v367_v28 = vsel %vm360_vm13, %v363_v24, %v366_v27  ;;  %vm461_vm2 = vweird.f32 %v1045_v55  ;;  %vm568_vm3 = vcmp.lt.s32.totalorder %v567_v33, 2 }
 0x206   :  { %v656_v6 = vor.u32 4788187, %v655_v48  ;;  %v659_v12 = vcvt.s32.f32 %v652_v11  ;;  %v467_v42 = vsel %vm465_vm11, %v803_v20, %v466_v39  ;;  %v368_v2 = vsel %vm357_vm1, nan, %v367_v28 }
 0x207   :  { %v471_v18 = vsel %vm464_vm14, %v467_v42, %v470_v40  ;;  %vm676_vm4 = vcmp.eq.s32.totalorder %v671_v56, 2  ;;  %vm565_vm5 = vweird.f32 %v1047_v0  ;;  %vm673_vm6 = vcmp.eq.s32.totalorder %v671_v56, 0 }
 0x208   :  { %v657_v5 = vand.u32 2147483647, %v656_v6  ;;  %v472_v59 = vsel %vm461_vm2, nan, %v471_v18 }
 0x209   :  { %v685_v62 = vcombine.low %v368_v2, %v472_v59 }
 0x20a   :  { %v660_v35 = vmul.f32 %v659_v12, %v657_v5  ;;  %v807_v37 = vpop.eup %806 }
 0x20b   :  { %v809_v36 = vpop.eup %808  ;;  %v573_v49 = vxor.u32 2147483648, %v807_v37  ;;  %v693_v31 = vrot.slane %v685_v62, %v952_v10 }
 0x20c   :  { %v661_v51 = vxor.u32 2147483648, %v660_v35  ;;  %v570_v16 = vxor.u32 2147483648, %v809_v36 }
 0x20d   :  { %v574_v7 = vsel %vm572_vm0, %v573_v49, %v809_v36 }
 0x20e   :  { %v662_v4 = vsel %vm579_vm7, %v661_v51, %v660_v35  ;;  %v571_v52 = vsel %vm569_vm15, %v807_v37, %v570_v16  ;;  %vm672_vm7 = vcmp.lt.s32.totalorder %v671_v56, 2 }
 0x20f   :  { %v665_v29 = vsel %vm1344_vm8, %v1056_v14, %v662_v4  ;;  %v575_v54 = vsel %vm568_vm3, %v571_v52, %v574_v7  ;;  %vm669_vm8 = vweird.f32 %v1056_v14 }
 0x210   :  { %810 = vcosq.f32 %v665_v29  ;;  %v576_v3 = vsel %vm565_vm5, nan, %v575_v54 }
 0x211   :  { %812 = vsinq.f32 %v665_v29 }
 0x21a   :  { %v811_v1 = vpop.eup %810 }
 0x21b   :  { %v813_v8 = vpop.eup %812  ;;  %v677_v60 = vxor.u32 2147483648, %v811_v1 }
 0x21c   :  { %v674_v61 = vxor.u32 2147483648, %v813_v8 }
 0x21d   :  { %v678_v53 = vsel %vm676_vm4, %v677_v60, %v813_v8 }
 0x21e   :  { %v675_v38 = vsel %vm673_vm6, %v811_v1, %v674_v61 }
 0x21f   :  { %v679_v63 = vsel %vm672_vm7, %v675_v38, %v678_v53 }
 0x220   :  { %v680_v55 = vsel %vm669_vm8, nan, %v679_v63 }
 0x221   :  { %v686_v47 = vcombine.low %v576_v3, %v680_v55 }
 0x223   :  { %v700_v22 = vrot.slane %v686_v47, %v952_v10 }
 0x225   :  { %v701_v11 = vcombine.low %v693_v31, %v700_v22 }
 0x227   :  { %703 = vst [vmem:[#allocation8] sm:$0xff] %v701_v11 }
 0x228   :  { %869 = shalt.err (!%p866_p6)
}
 0x229   :  { %s870_s16 = scalar_lea.hbm %s1375_s3, 128 }
 0x22a   :  { %p871_p7 = scmp.ne.s32.totalorder %s1375_s3, %s870_s16  ;;  %p874_p8 = scmp.lt.u32.totalorder %s870_s16, %s1375_s3 }
 0x22c   :  { %p876_p9 = pnand %p874_p8, %p871_p7 }
 0x22e   :  { %879 = shalt.err (!%p876_p9)
}
 0x22f   :  { %713 = dma.vmem_to_hbm [thread:$0]  %s711_s12, 128, %s1375_s3, [#allocation5]  }
 0x230   :  { %884 = dma.done.wait [#allocation5], 128  }
 0x231   :  { %885 = vsyncadd [#allocation5], 4294967168 }
 0x232   :  { %717 = vsyncpa [#allocation4], 1 }
 0x233   :  { %718 = vsyncpa [#allocation7], 1 }
 0x234   :  { %719 = vsyncpa [#allocation5], 1 }

</bundles_post_ra>
